<compile_context>
chip_gen: v5e
topology: v5e:2x2
jax: 0.10.0
libtpu: 0.0.40
codegen_flags: <defaults>
</compile_context>

<pallas_src>
import jax
import jax.numpy as jnp
from jax.experimental import pallas as pl
from jax.experimental.pallas import tpu as pltpu

SUBLANE = 8  # sublane granularity for the batch (second-to-last) dim


def _round_up(n, m):
    return ((n + m - 1) // m) * m


def _pos_tag_fc_kernel(x_ref, w1_ref, b1_ref, w2_ref, b2_ref, w3_ref, b3_ref,
                       out_ref):
    # layer1 + ReLU   (dropout = identity in eval mode)
    h1 = jnp.dot(x_ref[...], w1_ref[...], preferred_element_type=jnp.float32)
    h1 = jnp.maximum(h1 + b1_ref[...], 0.0)

    # layer2 + ReLU   (dropout2 = identity in eval mode)
    h2 = jnp.dot(h1.astype(w2_ref.dtype), w2_ref[...],
                 preferred_element_type=jnp.float32)
    h2 = jnp.maximum(h2 + b2_ref[...], 0.0)

    # layer3 (no activation); f32 bias add, store only the true out_size lanes
    h3 = jnp.dot(h2.astype(w3_ref.dtype), w3_ref[...],
                 preferred_element_type=jnp.float32)
    out_ref[...] = (h3 + b3_ref[...]).astype(out_ref.dtype)


def pos_tag_fc_forward(x, params, *, block_rows=4096,
                       compute_dtype=jnp.bfloat16,
                       vmem_limit_bytes=48 * 1024 * 1024):
    """x: [B, input_size]; params: dict of transposed weights/biases.

    compute_dtype: jnp.bfloat16 (recommended; native MXU dtype, f32
    accumulation and f32 bias/ReLU kept) or jnp.float32 (bit-exact vs an f32
    reference).
    """
    w1, b1 = params["w1"], params["b1"]
    w2, b2 = params["w2"], params["b2"]
    w3, b3 = params["w3"], params["b3"]

    B, in_size = x.shape
    h1_size, h2_size, out_size = w1.shape[1], w2.shape[1], w3.shape[1]

    # Pad batch only to a sublane multiple (cheap / usually a no-op); the
    # ragged final grid block is masked by Pallas on writeback.
    b_p = _round_up(B, SUBLANE)
    if b_p != B:
        x = jnp.pad(x, ((0, b_p - B), (0, 0)))

    # Batch tile: at most block_rows, but small enough that the grid has >= 2
    # steps for any non-trivial batch (lets "parallel" shard over v7x's 2 TCs).
    tb = min(block_rows, max(SUBLANE, _round_up(pl.cdiv(b_p, 2), SUBLANE)))
    grid = (pl.cdiv(b_p, tb),)

    x_c = x.astype(compute_dtype)
    w1_c = w1.astype(compute_dtype)
    w2_c = w2.astype(compute_dtype)
    w3_c = w3.astype(compute_dtype)
    # Biases stay f32: epilogue math is f32 everywhere (v5e has no bf16 VALU).
    b1_c = b1.astype(jnp.float32)
    b2_c = b2.astype(jnp.float32)
    b3_c = b3.astype(jnp.float32)

    def row_spec(shape):       # tiles along the batch axis
        return pl.BlockSpec(shape, lambda i: (i, 0))

    def const_spec(shape):     # weights/biases resident across the whole grid
        return pl.BlockSpec(shape, lambda i: (0, 0))

    itemsize = jnp.dtype(compute_dtype).itemsize
    flops = 2 * B * (in_size * h1_size + h1_size * h2_size
                     + h2_size * out_size)
    bytes_accessed = (
        b_p * in_size * itemsize
        + (w1_c.size + w2_c.size + w3_c.size) * itemsize
        + (b1_c.size + b2_c.size + b3_c.size) * 4
        + b_p * out_size * 4)

    out_padded = pl.pallas_call(
        _pos_tag_fc_kernel,
        out_shape=jax.ShapeDtypeStruct((b_p, out_size), jnp.float32),
        grid=grid,
        in_specs=[
            row_spec((tb, in_size)),
            const_spec((in_size, h1_size)), const_spec((1, h1_size)),
            const_spec((h1_size, h2_size)), const_spec((1, h2_size)),
            const_spec((h2_size, out_size)), const_spec((1, out_size)),
        ],
        out_specs=row_spec((tb, out_size)),
        compiler_params=pltpu.CompilerParams(
            dimension_semantics=("parallel",),
            vmem_limit_bytes=vmem_limit_bytes),
        cost_estimate=pl.CostEstimate(
            flops=flops, transcendentals=0, bytes_accessed=bytes_accessed),
    )(x_c, w1_c, b1_c, w2_c, b2_c, w3_c, b3_c)

    # Strip batch padding only (no lane padding was added).
    return out_padded[:B] if b_p != B else out_padded


def init_params(key, input_size, hidden_size, output_size):
    """Mimics nn.Linear's U(-1/sqrt(fan_in), +1/sqrt(fan_in)) init.

    Weights are stored transposed relative to PyTorch: [in_features, out_features].
    """
    dims = [
        (input_size, 2 * hidden_size),        # layer1
        (2 * hidden_size, hidden_size // 2),  # layer2
        (hidden_size // 2, output_size),      # layer3
    ]
    params = {}
    for idx, (fan_in, fan_out) in enumerate(dims, start=1):
        key, kw, kb = jax.random.split(key, 3)
        bound = 1.0 / jnp.sqrt(fan_in)
        params[f"w{idx}"] = jax.random.uniform(
            kw, (fan_in, fan_out), jnp.float32, minval=-bound, maxval=bound)
        params[f"b{idx}"] = jax.random.uniform(
            kb, (1, fan_out), jnp.float32, minval=-bound, maxval=bound)
    return params


def reference_forward(x, params):
    h1 = jnp.maximum(x @ params["w1"] + params["b1"], 0.0)
    h2 = jnp.maximum(h1 @ params["w2"] + params["b2"], 0.0)
    return h2 @ params["w3"] + params["b3"]


if __name__ == "__main__":
    # Small shapes consistent with PosTagFC(input_size, hidden_size, output_size)
    batch = 8
    input_size = 32
    hidden_size = 32     # -> layer1 out = 64, layer2 out = 16
    output_size = 8

    key = jax.random.PRNGKey(0)
    key, kx = jax.random.split(key)
    x = jax.random.normal(kx, (batch, input_size), jnp.float32)
    params = init_params(key, input_size, hidden_size, output_size)

    ref = reference_forward(x, params)

    # Exact f32 path: must match the f32 reference to tight tolerance.
    out_f32 = pos_tag_fc_forward(x, params, compute_dtype=jnp.float32)
    out_f32 = jax.block_until_ready(out_f32)
    assert out_f32.shape == (batch, output_size)
    assert jnp.allclose(out_f32, ref, atol=1e-5, rtol=1e-5), "mismatch vs reference"

    # Default bf16 path (recommended on TPU): smoke-test compile/run + loose check.
    out_bf16 = jax.block_until_ready(pos_tag_fc_forward(x, params))
    assert out_bf16.shape == (batch, output_size)
    assert bool(jnp.all(jnp.isfinite(out_bf16)))
    assert jnp.allclose(out_bf16, ref, atol=5e-2, rtol=5e-2), "bf16 path diverged"

    print("KERNEL_OK")
</pallas_src>

<mosaic_0001>
module attributes {stable_mosaic.version = 11 : i64} {
  func.func @_pos_tag_fc_kernel(%arg0: i32, %arg1: memref<8x32xf32, #tpu.memory_space<vmem>>, %arg2: memref<32x64xf32, #tpu.memory_space<vmem>>, %arg3: memref<1x64xf32, #tpu.memory_space<vmem>>, %arg4: memref<64x16xf32, #tpu.memory_space<vmem>>, %arg5: memref<1x16xf32, #tpu.memory_space<vmem>>, %arg6: memref<16x8xf32, #tpu.memory_space<vmem>>, %arg7: memref<1x8xf32, #tpu.memory_space<vmem>>, %arg8: memref<8x8xf32, #tpu.memory_space<vmem>>) attributes {dimension_semantics = [#tpu.dimension_semantics<parallel>], iteration_bounds = array<i64: 1>, scalar_prefetch = 0 : i64, scratch_operands = 0 : i64, tpu.core_type = #tpu.core_type<tc>, window_params = [{transform_indices = @transform_0, window_bounds = array<i64: 8, 32>}, {pipeline_mode = #tpu.pipeline_mode<synchronous>, transform_indices = @transform_1, window_bounds = array<i64: 32, 64>}, {pipeline_mode = #tpu.pipeline_mode<synchronous>, transform_indices = @transform_2, window_bounds = array<i64: 1, 64>}, {pipeline_mode = #tpu.pipeline_mode<synchronous>, transform_indices = @transform_3, window_bounds = array<i64: 64, 16>}, {pipeline_mode = #tpu.pipeline_mode<synchronous>, transform_indices = @transform_4, window_bounds = array<i64: 1, 16>}, {pipeline_mode = #tpu.pipeline_mode<synchronous>, transform_indices = @transform_5, window_bounds = array<i64: 16, 8>}, {pipeline_mode = #tpu.pipeline_mode<synchronous>, transform_indices = @transform_6, window_bounds = array<i64: 1, 8>}, {transform_indices = @transform_7, window_bounds = array<i64: 8, 8>}]} {
    %c0 = arith.constant 0 : index
    %c0_0 = arith.constant 0 : index
    %0 = vector.load %arg1[%c0, %c0_0] : memref<8x32xf32, #tpu.memory_space<vmem>>, vector<8x32xf32>
    %c0_1 = arith.constant 0 : index
    %c0_2 = arith.constant 0 : index
    %1 = vector.load %arg2[%c0_1, %c0_2] : memref<32x64xf32, #tpu.memory_space<vmem>>, vector<32x64xf32>
    %cst = arith.constant dense<0.000000e+00> : vector<8x64xf32>
    %2 = tpu.matmul %0, %1, %cst {dimension_numbers = #tpu.dot_dimension_numbers<[1], [0], [0], [1], [0, 0, 1, 1], [], []>} : vector<8x32xf32>, vector<32x64xf32>, vector<8x64xf32> -> vector<8x64xf32>
    %c0_3 = arith.constant 0 : index
    %c0_4 = arith.constant 0 : index
    %3 = vector.load %arg3[%c0_3, %c0_4] : memref<1x64xf32, #tpu.memory_space<vmem>>, vector<1x64xf32>
    %4 = vector.broadcast %3 : vector<1x64xf32> to vector<8x64xf32>
    %5 = arith.addf %2, %4 : vector<8x64xf32>
    %cst_5 = arith.constant 0.000000e+00 : f32
    %6 = vector.broadcast %cst_5 : f32 to vector<8x64xf32>
    %7 = arith.maximumf %5, %6 : vector<8x64xf32>
    %c0_6 = arith.constant 0 : index
    %c0_7 = arith.constant 0 : index
    %8 = vector.load %arg4[%c0_6, %c0_7] : memref<64x16xf32, #tpu.memory_space<vmem>>, vector<64x16xf32>
    %cst_8 = arith.constant dense<0.000000e+00> : vector<8x16xf32>
    %9 = tpu.matmul %7, %8, %cst_8 {dimension_numbers = #tpu.dot_dimension_numbers<[1], [0], [0], [1], [0, 0, 1, 1], [], []>} : vector<8x64xf32>, vector<64x16xf32>, vector<8x16xf32> -> vector<8x16xf32>
    %c0_9 = arith.constant 0 : index
    %c0_10 = arith.constant 0 : index
    %10 = vector.load %arg5[%c0_9, %c0_10] : memref<1x16xf32, #tpu.memory_space<vmem>>, vector<1x16xf32>
    %11 = vector.broadcast %10 : vector<1x16xf32> to vector<8x16xf32>
    %12 = arith.addf %9, %11 : vector<8x16xf32>
    %cst_11 = arith.constant 0.000000e+00 : f32
    %13 = vector.broadcast %cst_11 : f32 to vector<8x16xf32>
    %14 = arith.maximumf %12, %13 : vector<8x16xf32>
    %c0_12 = arith.constant 0 : index
    %c0_13 = arith.constant 0 : index
    %15 = vector.load %arg6[%c0_12, %c0_13] : memref<16x8xf32, #tpu.memory_space<vmem>>, vector<16x8xf32>
    %cst_14 = arith.constant dense<0.000000e+00> : vector<8x8xf32>
    %16 = tpu.matmul %14, %15, %cst_14 {dimension_numbers = #tpu.dot_dimension_numbers<[1], [0], [0], [1], [0, 0, 1, 1], [], []>} : vector<8x16xf32>, vector<16x8xf32>, vector<8x8xf32> -> vector<8x8xf32>
    %c0_15 = arith.constant 0 : index
    %c0_16 = arith.constant 0 : index
    %17 = vector.load %arg7[%c0_15, %c0_16] : memref<1x8xf32, #tpu.memory_space<vmem>>, vector<1x8xf32>
    %18 = vector.broadcast %17 : vector<1x8xf32> to vector<8x8xf32>
    %19 = arith.addf %16, %18 : vector<8x8xf32>
    %c0_17 = arith.constant 0 : index
    %c0_18 = arith.constant 0 : index
    %20 = vector.load %arg8[%c0_17, %c0_18] : memref<8x8xf32, #tpu.memory_space<vmem>>, vector<8x8xf32>
    tpu.vector_store %arg8[%c0_17, %c0_18], %19 {strides = array<i32>} : memref<8x8xf32, #tpu.memory_space<vmem>>, vector<8x8xf32>,
    return
  }
  func.func @transform_0(%arg0: i32) -> (i32, i32) {
    %c0_i32 = arith.constant 0 : i32
    %c0_i32_0 = arith.constant 0 : i32
    return %arg0, %c0_i32 : i32, i32
  }
  func.func @transform_1(%arg0: i32) -> (i32, i32) {
    %c0_i32 = arith.constant 0 : i32
    %c0_i32_0 = arith.constant 0 : i32
    %c0_i32_1 = arith.constant 0 : i32
    return %c0_i32, %c0_i32_0 : i32, i32
  }
  func.func @transform_2(%arg0: i32) -> (i32, i32) {
    %c0_i32 = arith.constant 0 : i32
    %c0_i32_0 = arith.constant 0 : i32
    %c0_i32_1 = arith.constant 0 : i32
    return %c0_i32, %c0_i32_0 : i32, i32
  }
  func.func @transform_3(%arg0: i32) -> (i32, i32) {
    %c0_i32 = arith.constant 0 : i32
    %c0_i32_0 = arith.constant 0 : i32
    %c0_i32_1 = arith.constant 0 : i32
    return %c0_i32, %c0_i32_0 : i32, i32
  }
  func.func @transform_4(%arg0: i32) -> (i32, i32) {
    %c0_i32 = arith.constant 0 : i32
    %c0_i32_0 = arith.constant 0 : i32
    %c0_i32_1 = arith.constant 0 : i32
    return %c0_i32, %c0_i32_0 : i32, i32
  }
  func.func @transform_5(%arg0: i32) -> (i32, i32) {
    %c0_i32 = arith.constant 0 : i32
    %c0_i32_0 = arith.constant 0 : i32
    %c0_i32_1 = arith.constant 0 : i32
    return %c0_i32, %c0_i32_0 : i32, i32
  }
  func.func @transform_6(%arg0: i32) -> (i32, i32) {
    %c0_i32 = arith.constant 0 : i32
    %c0_i32_0 = arith.constant 0 : i32
    %c0_i32_1 = arith.constant 0 : i32
    return %c0_i32, %c0_i32_0 : i32, i32
  }
  func.func @transform_7(%arg0: i32) -> (i32, i32) {
    %c0_i32 = arith.constant 0 : i32
    %c0_i32_0 = arith.constant 0 : i32
    return %arg0, %c0_i32 : i32, i32
  }
}

</mosaic_0001>

<bundles_post_ra>
// kernel: tpu_custom_call.1
= control target key start
LH: loop header
LB: loop body
LE: loop exit
PB: predicated region body
PF: predicated region fallthrough
CT: control target
= control target key end

     0   :  { %s277_s0 = inlined_call_operand.vmem [shape: f32[8,32], index: 0, kind: input, shape index: {}]   ;;  %s278_s1 = inlined_call_operand.vmem [shape: f32[32,64], index: 1, kind: input, shape index: {}]   ;;  %s279_s2 = inlined_call_operand.vmem [shape: f32[1,64], index: 2, kind: input, shape index: {}]   ;;  %s280_s3 = inlined_call_operand.vmem [shape: f32[64,16], index: 3, kind: input, shape index: {}]   ;;  %s281_s4 = inlined_call_operand.vmem [shape: f32[1,16], index: 4, kind: input, shape index: {}]   ;;  %s282_s5 = inlined_call_operand.vmem [shape: f32[16,8], index: 5, kind: input, shape index: {}]   ;;  %s283_s6 = inlined_call_operand.vmem [shape: f32[1,8], index: 6, kind: input, shape index: {}]   ;;  %s284_s7 = inlined_call_operand.hbm [shape: f32[8,8], index: 7, kind: output, shape index: {}]  }
   0x1   :  { %v31_v0 = vld [vmem:[%s278_s1 + $0x18] sm:$0xff]  ;;  %v30_v1 = vld [vmem:[%s278_s1 + $0x10] sm:$0xff]  ;;  %v29_v3 = vld [vmem:[%s278_s1 + $0x8] sm:$0xff] }
   0x2   :  { %52 = vmatpush.msra.mxu0 %v31_v0  ;;  %v68_v2 = vld [vmem:[%s280_s3 + $0x38] sm:$0xff]  ;;  %v67_v4 = vld [vmem:[%s280_s3 + $0x30] sm:$0xff]  ;;  %v28_v5 = vld [vmem:[%s278_s1] sm:$0xff] }
   0x3   :  { %85 = vmatpush.msra.mxu1 %v68_v2  ;;  %v66_v6 = vld [vmem:[%s280_s3 + $0x28] sm:$0xff] }
   0x4   :  { %53 = vmatpush.msra.mxu0 %v30_v1 }
   0x5   :  { %86 = vmatpush.msra.mxu1 %v67_v4 }
   0x6   :  { %12 = vsyncpa [#allocation3], 0  ;;  %54 = vmatpush.msra.mxu0 %v29_v3  ;;  %v27_v7 = vld [vmem:[%s277_s0] sm:$0xff]  ;;  %vm36_vm0 = vcmask 261120   ;;  %v64_v9 = vld [vmem:[%s280_s3 + $0x18] sm:$0xff]  ;;  %vm73_vm1 = vcmask 523264  }
   0x7   :  { %v65_v8 = vld [vmem:[%s280_s3 + $0x20] sm:$0xff]  ;;  %87 = vmatpush.msra.mxu1 %v66_v6  ;;  %v63_v10 = vld [vmem:[%s280_s3 + $0x10] sm:$0xff]  ;;  %v62_v11 = vld [vmem:[%s280_s3 + $0x8] sm:$0xff]  ;;  %vm104_vm2 = vcmask 130048   ;;  %s179_s10 = smov [#allocation2]   ;;  %vm128_vm3 = vcmask 64512  }
   0x8   :  { %55 = vmatpush.msra.mxu0 %v28_v5  ;;  %v61_v12 = vld [vmem:[%s280_s3] sm:$0xff]  ;;  %v99_v17 = vld [vmem:[%s282_s5 + $0x8] sm:$0xff]  ;;  %s135_s11 = sshll.u32 %s179_s10, 4  ;;  %s136_s11 = int_to_ptr.vmem [resolvable:$true] %s135_s11 }
   0x9   :  { %146 = vmatmul.msk.f32.vlgmr.msra.gmra.mxu0 %vm36_vm0, %v27_v7  ;;  %88 = vmatpush.msra.mxu1 %v65_v8  ;;  %v150_v13 = vld [vmem:[%s279_s2] ss:$0 sm:$0xff] }
   0xa   :  { %122 = vmatpush.msra.mxu2 %v99_v17  ;;  %v98_v18 = vld [vmem:[%s282_s5] sm:$0xff]  ;;  %s137_s5 = sshll.u32 %s284_s7, 4  ;;  %s138_s5 = int_to_ptr.hbm [resolvable:$true] %s137_s5 }
   0xb   :  { %89 = vmatpush.msra.mxu1 %v64_v9  ;;  %v151_v19 = vld [vmem:[%s281_s4] ss:$0 sm:$0xff] }
   0xc   :  { %123 = vmatpush.msra.mxu2 %v98_v18  ;;  %v152_v23 = vld [vmem:[%s283_s6] ss:$0 sm:$0xff] }
   0xd   :  { %90 = vmatpush.msra.mxu1 %v63_v10 }
   0xf   :  { %91 = vmatpush.msra.mxu1 %v62_v11 }
  0x11   :  { %92 = vmatpush.msra.mxu1 %v61_v12 }
  0x86   :  { %v57_v14 = vpop.f32.mrf.mxu0 }
  0x87   :  { %v58_v15 = vadd.f32 %v150_v13, %v57_v14 }
  0x89   :  { %v60_v16 = vmax.f32 %v58_v15, 0.0 }
  0x8b   :  { %147 = vmatmul.msk.f32.vlgmr.msra.gmra.mxu1 %vm73_vm1, %v60_v16 }
 0x108   :  { %v94_v20 = vpop.f32.mrf.mxu1 }
 0x109   :  { %v95_v21 = vadd.f32 %v151_v19, %v94_v20 }
 0x10b   :  { %v97_v22 = vmax.f32 %v95_v21, 0.0 }
 0x10d   :  { %148 = vmatmul.msk.f32.vlgmr.msra.gmra.mxu2 %vm104_vm2, %v97_v22 }
 0x190   :  { %v125_v24 = vpop.f32.mrf.mxu2 }
 0x191   :  { %v126_v25 = vadd.f32 %v152_v23, %v125_v24 }
 0x193   :  { %129 = vst.msk [vmem:[#allocation2] sm:$0xff] %vm128_vm3, %v126_v25 }
 0x194   :  { %140 = dma.vmem_to_hbm [thread:$0]  %s136_s11, 128, %s138_s5, [#allocation3]  }
 0x195   :  { %177 = dma.done.wait [#allocation3], 128  }
 0x196   :  { %178 = vsyncadd [#allocation3], 4294967168 }
 0x197   :  { %145 = vsyncpa [#allocation3], 1 }

</bundles_post_ra>
